<compile_context>
chip_gen: v5e
topology: v5e:2x2
jax: 0.10.0
libtpu: 0.0.40
codegen_flags: <defaults>
</compile_context>

<pallas_src>
import functools

import jax
import jax.numpy as jnp
from jax.experimental import pallas as pl
from jax.experimental.pallas import tpu as pltpu


def _se_kernel(x_ref, w1t_ref, b1_ref, w2t_ref, b2_ref, o_ref, *, inv_hw):
    # x_ref block: (TB, C, HWp). Pad columns (if any) are zero, so the sum over
    # the padded spatial axis divided by the *true* HW is the exact mean.
    x = x_ref[...]                                             # (TB, C, HWp)

    # squeeze: global average pool (lane-axis reduction)
    s = jnp.sum(x, axis=-1) * inv_hw                           # (TB, C)

    # compress: 1x1 conv == (TB, C) @ (C, mid) + bias, then ReLU
    h = jnp.dot(s, w1t_ref[...],
                preferred_element_type=jnp.float32) + b1_ref[...]
    h = jnp.maximum(h, 0.0)                                    # (TB, mid)

    # excitation: 1x1 conv == (TB, mid) @ (mid, C) + bias
    e = jnp.dot(h, w2t_ref[...],
                preferred_element_type=jnp.float32) + b2_ref[...]  # (TB, C)

    # softmax over channels (== dim=1 of the NCHW tensor), lane-axis reduction
    e = e - jnp.max(e, axis=-1, keepdims=True)
    p = jnp.exp(e)
    p = p * pl.reciprocal(jnp.sum(p, axis=-1, keepdims=True), approx=True)

    # scale input by channel attention (broadcast over spatial axis)
    o_ref[...] = x * p[:, :, None]


def se_forward(x, w1, b1, w2, b2, *,
               target_tile_bytes=1 << 20,        # ~1 MiB per x tile
               max_tile_footprint_bytes=12 << 20):  # fits v5e's 16 MiB scoped VMEM
    """SE forward pass.

    x : (N, C, H, W) float32
    w1: (mid, C)  compress 1x1 conv weight    b1: (mid,)
    w2: (C, mid)  excitation 1x1 conv weight  b2: (C,)
    """
    N, C, H, W = x.shape
    mid = w1.shape[0]
    HW = H * W

    # Lane-dense spatial axis: pad HW up to a multiple of 128 (unmasked stores).
    HWp = max(128, ((HW + 127) // 128) * 128)

    x3 = x.reshape(N, C, HW)
    if HWp != HW:
        x3 = jnp.pad(x3, ((0, 0), (0, 0), (0, HWp - HW)))

    # Pick the per-step batch tile TB: ~0.5-2 MiB tiles, with the
    # double-buffered footprint (2 input + 2 output buffers) capped so it fits
    # the smallest scoped-VMEM target (v5e 16 MiB, v7x 32 MiB).
    bytes_per_sample = C * HWp * 4
    tb = max(1, target_tile_bytes // bytes_per_sample)
    tb = min(tb, max(1, max_tile_footprint_bytes // (4 * bytes_per_sample)))
    tb = min(tb, N)
    # Keep >= 2 grid steps when N allows, so both v7x TensorCores stream tiles.
    if N >= 2 and tb >= N:
        tb = (N + 1) // 2

    n_pad = ((N + tb - 1) // tb) * tb
    if n_pad != N:
        # Zero-padded samples produce a finite softmax and out == 0; sliced off.
        x3 = jnp.pad(x3, ((0, n_pad - N), (0, 0), (0, 0)))

    # Lane-dense parameter layouts.
    w1t = jnp.transpose(w1)              # (C, mid)
    w2t = jnp.transpose(w2)              # (mid, C)
    b1r = jnp.reshape(b1, (1, mid))
    b2r = jnp.reshape(b2, (1, C))

    # Explicit VMEM budget: 2 in + 2 out buffers of the x tile, plus weights,
    # with ~25% headroom (clamped to sane bounds for all generations).
    weight_bytes = (w1t.size + w2t.size + b1r.size + b2r.size) * 4
    vmem_limit = int(1.25 * (4 * tb * bytes_per_sample + 2 * weight_bytes))
    vmem_limit = max(vmem_limit, 4 << 20)
    vmem_limit = min(vmem_limit, 64 << 20)

    kernel = functools.partial(_se_kernel, inv_hw=1.0 / HW)

    out3 = pl.pallas_call(
        kernel,
        out_shape=jax.ShapeDtypeStruct((n_pad, C, HWp), x.dtype),
        grid_spec=pltpu.PrefetchScalarGridSpec(
            num_scalar_prefetch=0,
            grid=(n_pad // tb,),
            in_specs=[
                pl.BlockSpec((tb, C, HWp), lambda b: (b, 0, 0)),   # x tile
                pl.BlockSpec((C, mid), lambda b: (0, 0)),          # compress W^T
                pl.BlockSpec((1, mid), lambda b: (0, 0)),          # compress bias
                pl.BlockSpec((mid, C), lambda b: (0, 0)),          # excitation W^T
                pl.BlockSpec((1, C), lambda b: (0, 0)),            # excitation bias
            ],
            out_specs=pl.BlockSpec((tb, C, HWp), lambda b: (b, 0, 0)),
        ),
        compiler_params=pltpu.CompilerParams(
            dimension_semantics=("parallel",),
            vmem_limit_bytes=vmem_limit,
        ),
    )(x3, w1t, b1r, w2t, b2r)

    out3 = out3[:N, :, :HW]
    return out3.reshape(N, C, H, W)


def se_reference(x, w1, b1, w2, b2):
    # pure-JAX reference for sanity checking
    s = jnp.mean(x, axis=(2, 3))                              # (N, C)
    h = jnp.maximum(s @ w1.T + b1, 0.0)                       # (N, mid)
    e = h @ w2.T + b2                                         # (N, C)
    p = jax.nn.softmax(e, axis=1)                             # (N, C)
    return x * p[:, :, None, None]


if __name__ == "__main__":
    # small shapes consistent with the module
    N, C, H, W = 2, 4, 16, 16
    ratio = 2
    mid = C // ratio

    key = jax.random.PRNGKey(0)
    kx, k1, k2, k3, k4 = jax.random.split(key, 5)

    x = jax.random.normal(kx, (N, C, H, W), dtype=jnp.float32)
    # synthetic parameters (shapes match nn.Conv2d 1x1 kernels / biases)
    w1 = jax.random.normal(k1, (mid, C), dtype=jnp.float32) * 0.5   # compress.weight
    b1 = jax.random.normal(k2, (mid,), dtype=jnp.float32) * 0.1     # compress.bias
    w2 = jax.random.normal(k3, (C, mid), dtype=jnp.float32) * 0.5   # excitation.weight
    b2 = jax.random.normal(k4, (C,), dtype=jnp.float32) * 0.1       # excitation.bias

    out = se_forward(x, w1, b1, w2, b2)
    out = jax.block_until_ready(out)

    ref = se_reference(x, w1, b1, w2, b2)
    assert out.shape == (N, C, H, W)
    # tolerance accounts for the EUP approx-reciprocal in the softmax denominator
    assert jnp.allclose(out, ref, atol=1e-3, rtol=1e-3), float(
        jnp.max(jnp.abs(out - ref)))

    print("KERNEL_OK")
</pallas_src>

<mosaic_0001>
module attributes {stable_mosaic.version = 11 : i64} {
  func.func @_se_kernel(%arg0: i32, %arg1: memref<1x4x256xf32, #tpu.memory_space<vmem>>, %arg2: memref<4x2xf32, #tpu.memory_space<vmem>>, %arg3: memref<1x2xf32, #tpu.memory_space<vmem>>, %arg4: memref<2x4xf32, #tpu.memory_space<vmem>>, %arg5: memref<1x4xf32, #tpu.memory_space<vmem>>, %arg6: memref<1x4x256xf32, #tpu.memory_space<vmem>>) attributes {dimension_semantics = [#tpu.dimension_semantics<parallel>], iteration_bounds = array<i64: 2>, scalar_prefetch = 0 : i64, scratch_operands = 0 : i64, tpu.core_type = #tpu.core_type<tc>, window_params = [{transform_indices = @transform_0, window_bounds = array<i64: 1, 4, 256>}, {pipeline_mode = #tpu.pipeline_mode<synchronous>, transform_indices = @transform_1, window_bounds = array<i64: 4, 2>}, {pipeline_mode = #tpu.pipeline_mode<synchronous>, transform_indices = @transform_2, window_bounds = array<i64: 1, 2>}, {pipeline_mode = #tpu.pipeline_mode<synchronous>, transform_indices = @transform_3, window_bounds = array<i64: 2, 4>}, {pipeline_mode = #tpu.pipeline_mode<synchronous>, transform_indices = @transform_4, window_bounds = array<i64: 1, 4>}, {transform_indices = @transform_5, window_bounds = array<i64: 1, 4, 256>}]} {
    %c0 = arith.constant 0 : index
    %c0_0 = arith.constant 0 : index
    %c0_1 = arith.constant 0 : index
    %0 = vector.load %arg1[%c0, %c0_0, %c0_1] : memref<1x4x256xf32, #tpu.memory_space<vmem>>, vector<1x4x256xf32>
    %cst = arith.constant dense<0.000000e+00> : vector<1x4xf32>
    %1 = vector.multi_reduction <add>, %0, %cst [2] : vector<1x4x256xf32> to vector<1x4xf32>
    %cst_2 = arith.constant 3.906250e-03 : f32
    %2 = vector.broadcast %cst_2 : f32 to vector<1x4xf32>
    %3 = arith.mulf %1, %2 : vector<1x4xf32>
    %c0_3 = arith.constant 0 : index
    %c0_4 = arith.constant 0 : index
    %4 = vector.load %arg2[%c0_3, %c0_4] : memref<4x2xf32, #tpu.memory_space<vmem>>, vector<4x2xf32>
    %cst_5 = arith.constant dense<0.000000e+00> : vector<1x2xf32>
    %5 = tpu.matmul %3, %4, %cst_5 {dimension_numbers = #tpu.dot_dimension_numbers<[1], [0], [0], [1], [0, 0, 1, 1], [], []>} : vector<1x4xf32>, vector<4x2xf32>, vector<1x2xf32> -> vector<1x2xf32>
    %c0_6 = arith.constant 0 : index
    %c0_7 = arith.constant 0 : index
    %6 = vector.load %arg3[%c0_6, %c0_7] : memref<1x2xf32, #tpu.memory_space<vmem>>, vector<1x2xf32>
    %7 = arith.addf %5, %6 : vector<1x2xf32>
    %cst_8 = arith.constant 0.000000e+00 : f32
    %8 = vector.broadcast %cst_8 : f32 to vector<1x2xf32>
    %9 = arith.maximumf %7, %8 : vector<1x2xf32>
    %c0_9 = arith.constant 0 : index
    %c0_10 = arith.constant 0 : index
    %10 = vector.load %arg4[%c0_9, %c0_10] : memref<2x4xf32, #tpu.memory_space<vmem>>, vector<2x4xf32>
    %cst_11 = arith.constant dense<0.000000e+00> : vector<1x4xf32>
    %11 = tpu.matmul %9, %10, %cst_11 {dimension_numbers = #tpu.dot_dimension_numbers<[1], [0], [0], [1], [0, 0, 1, 1], [], []>} : vector<1x2xf32>, vector<2x4xf32>, vector<1x4xf32> -> vector<1x4xf32>
    %c0_12 = arith.constant 0 : index
    %c0_13 = arith.constant 0 : index
    %12 = vector.load %arg5[%c0_12, %c0_13] : memref<1x4xf32, #tpu.memory_space<vmem>>, vector<1x4xf32>
    %13 = arith.addf %11, %12 : vector<1x4xf32>
    %cst_14 = arith.constant dense<0xFF800000> : vector<1xf32>
    %14 = vector.multi_reduction <maximumf>, %13, %cst_14 [1] : vector<1x4xf32> to vector<1xf32>
    %15 = vector.shape_cast %14 : vector<1xf32> to vector<1x1xf32>
    %16 = vector.broadcast %15 : vector<1x1xf32> to vector<1x4xf32>
    %17 = arith.subf %13, %16 : vector<1x4xf32>
    %18 = math.exp %17 : vector<1x4xf32>
    %cst_15 = arith.constant dense<0.000000e+00> : vector<1xf32>
    %19 = vector.multi_reduction <add>, %18, %cst_15 [1] : vector<1x4xf32> to vector<1xf32>
    %20 = vector.shape_cast %19 : vector<1xf32> to vector<1x1xf32>
    %21 = tpu.reciprocal %20 {approx = true} : vector<1x1xf32> -> vector<1x1xf32>
    %22 = vector.broadcast %21 : vector<1x1xf32> to vector<1x4xf32>
    %23 = arith.mulf %18, %22 : vector<1x4xf32>
    %24 = vector.shape_cast %23 : vector<1x4xf32> to vector<1x4x1xf32>
    %25 = vector.broadcast %24 : vector<1x4x1xf32> to vector<1x4x256xf32>
    %26 = arith.mulf %0, %25 : vector<1x4x256xf32>
    %c0_16 = arith.constant 0 : index
    %c0_17 = arith.constant 0 : index
    %c0_18 = arith.constant 0 : index
    %27 = vector.load %arg6[%c0_16, %c0_17, %c0_18] : memref<1x4x256xf32, #tpu.memory_space<vmem>>, vector<1x4x256xf32>
    tpu.vector_store %arg6[%c0_16, %c0_17, %c0_18], %26 {strides = array<i32>} : memref<1x4x256xf32, #tpu.memory_space<vmem>>, vector<1x4x256xf32>,
    return
  }
  func.func @transform_0(%arg0: i32) -> (i32, i32, i32) {
    %c0_i32 = arith.constant 0 : i32
    %c0_i32_0 = arith.constant 0 : i32
    %c0_i32_1 = arith.constant 0 : i32
    return %arg0, %c0_i32, %c0_i32_0 : i32, i32, i32
  }
  func.func @transform_1(%arg0: i32) -> (i32, i32) {
    %c0_i32 = arith.constant 0 : i32
    %c0_i32_0 = arith.constant 0 : i32
    %c0_i32_1 = arith.constant 0 : i32
    return %c0_i32, %c0_i32_0 : i32, i32
  }
  func.func @transform_2(%arg0: i32) -> (i32, i32) {
    %c0_i32 = arith.constant 0 : i32
    %c0_i32_0 = arith.constant 0 : i32
    %c0_i32_1 = arith.constant 0 : i32
    return %c0_i32, %c0_i32_0 : i32, i32
  }
  func.func @transform_3(%arg0: i32) -> (i32, i32) {
    %c0_i32 = arith.constant 0 : i32
    %c0_i32_0 = arith.constant 0 : i32
    %c0_i32_1 = arith.constant 0 : i32
    return %c0_i32, %c0_i32_0 : i32, i32
  }
  func.func @transform_4(%arg0: i32) -> (i32, i32) {
    %c0_i32 = arith.constant 0 : i32
    %c0_i32_0 = arith.constant 0 : i32
    %c0_i32_1 = arith.constant 0 : i32
    return %c0_i32, %c0_i32_0 : i32, i32
  }
  func.func @transform_5(%arg0: i32) -> (i32, i32, i32) {
    %c0_i32 = arith.constant 0 : i32
    %c0_i32_0 = arith.constant 0 : i32
    %c0_i32_1 = arith.constant 0 : i32
    return %arg0, %c0_i32, %c0_i32_0 : i32, i32, i32
  }
}

</mosaic_0001>

<bundles_post_ra>
// kernel: tpu_custom_call.1
= control target key start
LH: loop header
LB: loop body
LE: loop exit
PB: predicated region body
PF: predicated region fallthrough
CT: control target
= control target key end

     0   :  { %10 = vsyncpa [#allocation3], 0  ;;  %s779_s0 = inlined_call_operand.hbm [shape: f32[2,4,256], index: 0, kind: input, shape index: {}]   ;;  %s780_s1 = inlined_call_operand.vmem [shape: f32[4,2], index: 1, kind: input, shape index: {}]   ;;  %s781_s2 = inlined_call_operand.vmem [shape: f32[1,2], index: 2, kind: input, shape index: {}]   ;;  %s782_s3 = inlined_call_operand.vmem [shape: f32[2,4], index: 3, kind: input, shape index: {}]   ;;  %s783_s4 = inlined_call_operand.vmem [shape: f32[1,4], index: 4, kind: input, shape index: {}]   ;;  %s784_s5 = inlined_call_operand.hbm [shape: f32[2,4,256], index: 5, kind: output, shape index: {}]  }
   0x1   :  { %12 = vsyncpa [#allocation3 + $0x1], 0 }
   0x2   :  { %13 = vsyncpa [#allocation4], 0 }
   0x3   :  { %15 = vsyncpa [#allocation4 + $0x1], 0  ;;  %s636_s18 = smov 0   ;;  %s638_s19 = smov 0  }
   0x4   :  { %s640_s20 = smov 0   ;;  %s642_s21 = smov 0  }
   0x5 LB: > { %s657_s22 = sadd.s32 4294967295, %s603_s21   ;;  %s434_s23 = sadd.s32 4294967294, %s603_s21   ;;  %s603_s21 = sphi %s642_s21, %s794_s21   ;;  %s599_s20 = sphi %s640_s20, %s793_s20   ;;  %s595_s19 = sphi %s638_s19, %s792_s19   ;;  %s591_s18 = sphi %s636_s18, %s791_s18  }
   0x6   : > { %s661_s24 = sadd.s32 1, %s603_s21   ;;  %s28_s25 = sadd.s32 1, %s599_s20 }
   0x7   : > { %s25_s26 = ssub.s32 %s603_s21, %s661_s24  ;;  %p35_p0 = scmp.ne.s32.totalorder %s599_s20, %s595_s19 }
   0x8   : > { %p26_p1 = scmp.eq.s32.totalorder %s25_s26, 0  ;;  %p36_p2 = scmp.eq.s32.totalorder %s603_s21, 0 }
   0x9   : > { %p41_p3 = scmp.ne.s32.totalorder %s595_s19, %s591_s18  ;;  %p42_p4 = scmp.eq.s32.totalorder %s657_s22, 0 }
   0xa   : > { %s673_s27 = scalar_select %p26_p1, %s599_s20, %s28_s25  }
   0xb   : > { %p675_p5 = por %p36_p2, %p35_p0  ;;  %p679_p6 = por %p42_p4, %p41_p3 }
   0xc   : > { %p149_p7 = scmp.eq.s32.totalorder %s657_s22, 1  ;;  %p155_p8 = scmp.eq.s32.totalorder %s434_s23, 1 }
   0xd   : > { %p466_p10 = scmp.lt.s32.totalorder %s603_s21, 2  ;;  %s187_s7 = sand.u32 1, %s599_s20  }
   0xe   : > { %p686_p11 = por %p149_p7, %p35_p0  ;;  %p690_p12 = por %p155_p8, %p41_p3 }
   0xf   : > { %s452_s8 = sshll.u32 %s603_s21, 3  ;;  %s437_s9 = sshll.u32 %s187_s7, 3 }
  0x10   : > { %s196_s12 = scalar_lea.hbm %s779_s0, %s452_s8  ;;  %s191_s14 = scalar_lea.vmem [#allocation2], %s437_s9 }
  0x11   : > { %s198_s13 = sshll.u32 %s196_s12, 4  ;;  %s200_s15 = sshll.u32 %s191_s14, 4  ;;  %s199_s13 = int_to_ptr.hbm [resolvable:$true] %s198_s13  ;;  %s201_s15 = int_to_ptr.vmem [resolvable:$true] %s200_s15 }
  0x12   : > { %p701_p13 = pnand %p466_p10, %p675_p5  ;;  %p440_p0 = scmp.ge.s32.totalorder %s603_s21, 1 }
  0x13   : > { %p205_p1 = scmp.lt.s32.totalorder %s603_s21, 3  ;;  %s188_s17 = scalar_lea.sflag [#allocation3], %s187_s7 }
  0x14   : > { %s507_s23 = sshra.s32 %s199_s13, 4  ;;  %p511_p3 = pneg %p701_p13  ;;  %s508_s23 = int_to_ptr.hbm [resolvable:$true] %s507_s23 }
  0x15   : > { %s509_s25 = scalar_lea.hbm %s508_s23, 8  ;;  %s514_s28 = scalar_lea.hbm %s779_s0, 16 }
  0x16   : > { %p510_p2 = scmp.ne.s32.totalorder %s508_s23, %s509_s25  ;;  %p515_p5 = scmp.lt.s32.totalorder %s508_s23, %s779_s0 }
  0x17   : > { %p516_p8 = scmp.lt.s32.totalorder %s514_s28, %s509_s25 }
  0x18   : > { %p512_p4 = pnand %p511_p3, %p510_p2 }
  0x19   : > { %p517_p10 = por %p516_p8, %p515_p5 }
  0x1a   : > { %p513_p7 = pneg %p512_p4 }
  0x1c   : > { %p518_p9 = pnand %p517_p10, %p513_p7 }
  0x1e   : > { %521 = shalt.err (!%p518_p9)
}
  0x1f   : > { %461 = dma.hbm_to_vmem [thread:$0]  (!%p701_p13), %s199_s13, 128, %s201_s15, %s188_s17  }
  0x20   : > { %p206_p2 = pnand %p440_p0, %p205_p1 }
  0x21   : > { %s722_s7 = sand.u32 (!%p206_p2), 1, %s595_s19  }
  0x22   : > { %209 = sbr.rel (%p206_p2) target bundleno = 808 (0x328), region = 40  ;;  %s441_s11 = sshll.u32 (!%p206_p2), %s722_s7, 3 }
  0x23   : > { %s212_s12 = scalar_lea.sflag (!%p206_p2), [#allocation3], %s722_s7  ;;  %s215_s14 = scalar_lea.vmem (!%p206_p2), [#allocation2], %s441_s11 }
  0x27   : > { %582 = dma.done.wait (%p679_p6), %s212_s12, 128  }
  0x28   : > { %584 = vsyncadd (%p679_p6), %s212_s12, 4294967168  ;;  %v243_v0 = vld [vmem:[%s215_s14] sm:$0xff]  ;;  %vm250_vm0 = vcmask 1043456   ;;  %v257_v6 = vld [vmem:[%s780_s1] sm:$0xf]  ;;  %v260_v7 = vlaneseq  ;;  %vm263_vm1 = vcmask 31744  }
  0x29   : > { %245 = vst [vmem:[#allocation1] ss:$2 sm:$0xff] %v243_v0  ;;  %443 = vmatpush.msk.msra.mxu0 %vm250_vm0, %v257_v6  ;;  %v290_v12 = vld [vmem:[%s782_s3] sm:$0x3]  ;;  %vm296_vm2 = vcmask 1041408   ;;  %vm292_vm3 = vcmask 15360  }
  0x2a   : > { %v261_v8 = vand.u32 127, %v260_v7  ;;  %445 = vmatpush.msk.msra.mxu1 %vm296_vm2, %v290_v12  ;;  %v258_v13 = vld [vmem:[%s781_s2] sm:$0x1]  ;;  %vm320_vm4 = vcmask 24576   ;;  %v334_v26 = vshrl.u32 %v260_v7, 7  ;;  %s453_s8 = sshll.u32 %s657_s22, 3 }
  0x2b   : > { %v291_v17 = vld [vmem:[%s783_s4] sm:$0x1]  ;;  %v605_v31 = vmov 839922192   ;;  %s359_s10 = scalar_lea.hbm %s784_s5, %s453_s8  ;;  %s242_s12 = scalar_lea.vmem [#allocation5], %s441_s11 }
  0x2c   : > { %501 = vset.pattern.permute.xlu1 %v334_v26  ;;  %502 = vset.pattern.permute.xlu0 %v334_v26  ;;  %v341_v32 = vunpack.c.l.s4 %v605_v31  ;;  %s361_s14 = sshll.u32 %s242_s12, 4  ;;  %s363_s13 = sshll.u32 %s359_s10, 4  ;;  %s362_s14 = int_to_ptr.vmem [resolvable:$true] %s361_s14  ;;  %s364_s13 = int_to_ptr.hbm [resolvable:$true] %s363_s13 }
  0x2d   : > { %s348_s15 = scalar_lea.sflag [#allocation4], %s722_s7  ;;  %s551_s29 = sshra.s32 %s364_s13, 4  ;;  %s552_s29 = int_to_ptr.hbm [resolvable:$true] %s551_s29 }
  0x2e   : > { %v342_v33 = vunpack.c.0.s8 %v341_v32  ;;  %s553_s22 = scalar_lea.hbm %s552_s29, 8  ;;  %s557_s23 = scalar_lea.hbm %s784_s5, 16 }
  0x2f   : > { %p554_p6 = scmp.ne.s32.totalorder %s552_s29, %s553_s22  ;;  %p558_p0 = scmp.lt.s32.totalorder %s552_s29, %s784_s5 }
  0x30   : > { %v246_v1 = vld.sshfl [vmem:[#allocation1] sm:$0xff pattern:$0x75316420]  ;;  %v247_v2 = vld.sshfl [vmem:[#allocation1 + $0x8] sm:$0xff pattern:$0x75316420]  ;;  %p559_p1 = scmp.lt.s32.totalorder %s557_s23, %s553_s22 }
  0x31   : > { %v251_v3 = vsel %vm250_vm0, %v246_v1, 0.0  ;;  %v252_v4 = vsel %vm250_vm0, %v247_v2, 0.0  ;;  %p555_p9 = pnand %p554_p6, %p686_p11 }
  0x32   : > { %v253_v5 = vadd.f32 %v252_v4, %v251_v3  ;;  %p560_p3 = por %p559_p1, %p558_p0 }
  0x33   : > { %p556_p13 = pneg %p555_p9 }
  0x34   : > { %254 = vadd.xlane.f32.xlu0 %v253_v5 }
  0x35   : > { %p561_p4 = pnand %p560_p3, %p556_p13 }
  0xa7   : > { %v255_v9 = vpop.xlane.xlu0 %254 }
  0xa8   : > { %v256_v10 = vmul.f32 0.00390625, %v255_v9 }
  0xaa   : > { %v262_v11 = vperm.slane %v256_v10, %v261_v8 }
  0xac   : > { %444 = vmatmul.msk.f32.vlgmr.msra.gmra.mxu0 %vm263_vm1, %v262_v11 }
 0x129   : > { %v286_v14 = vpop.f32.mrf.mxu0 }
 0x12a   : > { %v287_v15 = vadd.f32 %v286_v14, %v258_v13 }
 0x12c   : > { %v289_v16 = vmax.f32 %v287_v15, 0.0 }
 0x12e   : > { %446 = vmatmul.msk.f32.vlgmr.msra.gmra.mxu1 %vm292_vm3, %v289_v16 }
 0x1ab   : > { %v317_v18 = vpop.f32.mrf.mxu1 }
 0x1ac   : > { %v318_v19 = vadd.f32 %v317_v18, %v291_v17 }
 0x1ae   : > { %v321_v20 = vsel %vm320_vm4, %v318_v19, -inf }
 0x1af   : > { %322 = vmax.xlane.f32.xlu0 %v321_v20 }
 0x222   : > { %v323_v21 = vpop.xlane.xlu0 %322 }
 0x223   : > { %v324_v22 = vsub.f32 %v318_v19, %v323_v21 }
 0x225   : > { %v325_v23 = vmul.f32 1.442695, %v324_v22 }
 0x227   : > { %503 = vpow2.f32 %v325_v23 }
 0x22d   : > { %v504_v24 = vpop.eup %503 }
 0x22e   : > { %v327_v25 = vsel %vm320_vm4, %v504_v24, 0.0 }
 0x22f   : > { %328 = vadd.xlane.f32.xlu1 %v327_v25 }
 0x2a2   : > { %v329_v27 = vpop.xlane.xlu1 %328 }
 0x2a3   : > { %505 = vrcp.f32 %v329_v27 }
 0x2a9   : > { %v506_v28 = vpop.eup %505 }
 0x2aa   : > { %v331_v29 = vmul.f32 %v506_v28, %v504_v24 }
 0x2ac   : > { %v332_v30 = vperm.slane %v331_v29, 0 }
 0x2ae   : > { %337 = vperm.xlu1 %501, %v332_v30  }
 0x320   : > { %v338_v34 = vpop.permute.xlu1 %337 }
 0x321   : > { %v343_v35 = vperm.slane %v338_v34, %v342_v33 }
 0x323   : > { %v345_v36 = vmul.f32 %v343_v35, %v243_v0 }
 0x325   : > { %346 = vst [vmem:[%s242_s12] sm:$0xff] %v345_v36 }
 0x326   : > { %564 = shalt.err (!%p561_p4)
}
 0x327   : > { %456 = dma.vmem_to_hbm [thread:$0]  (%p686_p11), %s362_s14, 128, %s364_s13, %s348_s15  }
 0x328 PF: > { %s375_s7 = sand.u32 1, %s591_s18   ;;  %p790_p7 = scmp.ge.s32.totalorder %s603_s21, 2 }
 0x329   : > { %s376_s26 = scalar_lea.sflag [#allocation4], %s375_s7 }
 0x32a   : > { %p463_p5 = pnand %p790_p7, %p690_p12 }
 0x32c   : > { %p464_p8 = pneg %p463_p5 }
 0x32e   : > { %586 = dma.done.wait (%p464_p8), %s376_s26, 128  }
 0x32f   : > { %588 = vsyncadd (%p464_p8), %s376_s26, 4294967168  ;;  %p18_p10 = scmp.ge.s32.totalorder %s661_s24, 4   ;;  %s791_s18 = smov %s595_s19 }
 0x330   : > { %s792_s19 = smov %s599_s20  ;;  %s793_s20 = smov %s673_s27 }
 0x331   : > { %s794_s21 = smov %s661_s24  ;;  %20 = sbr.rel (!%p18_p10) target bundleno = 5 (0x5), region = 85 }
 0x336   :  { %382 = vsyncpa [#allocation3], 1 }
 0x337   :  { %384 = vsyncpa [#allocation3 + $0x1], 1 }
 0x338   :  { %385 = vsyncpa [#allocation4], 1 }
 0x339   :  { %387 = vsyncpa [#allocation4 + $0x1], 1 }

</bundles_post_ra>
